<compile_context>
chip_gen: v5e
topology: v5e:2x2
jax: 0.10.0
libtpu: 0.0.40
codegen_flags: <defaults>
</compile_context>

<pallas_src>
import functools

import jax
import jax.numpy as jnp
from jax import lax
from jax.experimental import pallas as pl
from jax.experimental.pallas import tpu as pltpu


def _brenner_kernel(x_ref, halo_ref, out_ref, *, total_h, num_tiles):
    """One row-tile of the Brenner sum.

    x_ref:    (tile_h, w) block of x, rows [t*tile_h, t*tile_h + tile_h).
    halo_ref: (8, w) block of x: the last 8 rows of the *previous* tile
              (clamped to block 0 for t == 0; masked out in that case).
    out_ref:  (8, w) f32 partial sums for this tile (reduced in the wrapper).
    """
    t = pl.program_id(0)
    tile_h, w = x_ref.shape
    ngroups = tile_h // 8
    last_idx = num_tiles - 1

    x = x_ref[...].astype(jnp.float32)          # per-tile upcast
    halo = halo_ref[...].astype(jnp.float32)

    # Shift-by-2 copies (XLU rotates).  pltpu.roll needs non-negative shifts:
    # rolling by (size - 2) == rolling by -2; the wrap region is masked below.
    x_col = pltpu.roll(x, shift=w - 2, axis=1)        # x[i, j+2] at (i, j)
    x_row = pltpu.roll(x, shift=tile_h - 2, axis=0)   # x[i+2, j] at (i, j)
    halo2 = pltpu.roll(halo, shift=2, axis=0)         # rows 0,1 = rows row0-2, row0-1

    k8 = lax.broadcasted_iota(jnp.int32, (8, w), 0)              # sublane idx
    colmask = lax.broadcasted_iota(jnp.int32, (8, w), 1) < (w - 2)

    row0 = t * tile_h

    def tile_sum(last: bool):
        acc = jnp.zeros((8, w), jnp.float32)
        for g in range(ngroups):
            lo = g * 8
            xg = x[lo:lo + 8, :]
            gi = (row0 + lo) + k8 if last else None   # global rows, last tile only

            # Horizontal term: dy[i, j] = x[i, j+2] - x[i, j], j < w - 2.
            dy = x_col[lo:lo + 8, :] - xg
            dy_sq = jnp.where(colmask, dy * dy, 0.0)
            if last:
                dy_sq = jnp.where(gi < total_h, dy_sq, 0.0)       # ragged rows

            # Vertical term (within this tile): dx[i, j] = x[i+2, j] - x[i, j].
            dx = x_row[lo:lo + 8, :] - xg
            dx_sq = dx * dx
            if last:
                dx_sq = jnp.where(gi < total_h - 2, dx_sq, 0.0)   # ragged + wrap
            elif g == ngroups - 1:
                # Only the tile's last 2 rows wrap; handled via the next
                # tile's halo term instead.
                dx_sq = jnp.where(k8 < 6, dx_sq, 0.0)

            acc = acc + (dy_sq + dx_sq)

        # Vertical terms straddling the boundary with the previous tile:
        #   x[row0 + k] - x[row0 - 2 + k], k in {0, 1}.
        db = x[0:8, :] - halo2
        bmask = (k8 < 2) & (t > 0)
        if last:
            bmask = bmask & ((row0 + k8) < total_h)
        return acc + jnp.where(bmask, db * db, 0.0)

    if num_tiles == 1:
        out_ref[...] = tile_sum(last=True)
    else:
        @pl.when(t < last_idx)
        def _():
            out_ref[...] = tile_sum(last=False)      # mask-free hot path

        @pl.when(t == last_idx)
        def _():
            out_ref[...] = tile_sum(last=True)       # ragged-height masking


def brenner(x: jax.Array, weight, *, tile_h: int | None = None) -> jax.Array:
    """Brenner regularizer of a 2-D array x, scaled by `weight` (scalar out)."""
    assert x.ndim == 2, "Brenner expects a 2-D input (H, W)"
    h, w = x.shape
    assert w >= 2, "Brenner kernel expects W >= 2"
    padded_h = ((h + 7) // 8) * 8

    itemsize = x.dtype.itemsize
    if tile_h is None:
        # ~4 MiB of *input* bytes per block (sized from the input dtype so
        # bf16 gets 2x taller tiles).  In-kernel f32 temporaries (x + 2 rolled
        # copies) plus double-buffered input blocks stay well under the
        # 48 MiB VMEM limit on every generation, v7x's 64 MiB included.
        tile_h = (4 * 1024 * 1024) // max(w * itemsize, 1)
    tile_h = max(8, min(512, (tile_h // 8) * 8))
    if padded_h >= 16:
        # Keep at least 2 grid steps so ("parallel",) can use both v7x cores.
        tile_h = min(tile_h, max(8, (padded_h // 2) // 8 * 8))
    tile_h = min(tile_h, padded_h)

    num_tiles = -(-h // tile_h)
    hb = tile_h // 8            # halo stride in units of 8-row blocks

    kernel = functools.partial(_brenner_kernel, total_h=h, num_tiles=num_tiles)

    flops = 7 * h * w
    bytes_accessed = (h * w * itemsize                 # main tiles
                      + num_tiles * 8 * w * itemsize   # halo re-reads
                      + num_tiles * 8 * w * 4)         # partial writeback

    partials = pl.pallas_call(
        kernel,
        out_shape=jax.ShapeDtypeStruct((num_tiles * 8, w), jnp.float32),
        grid=(num_tiles,),
        in_specs=[
            # Main row tile.
            pl.BlockSpec((tile_h, w), lambda i: (i, 0)),
            # 2-row vertical halo, carried as the previous tile's last 8 rows;
            # clamped to block 0 for the first tile (masked in the kernel).
            pl.BlockSpec((8, w), lambda i: (jnp.maximum(i * hb - 1, 0), 0)),
        ],
        out_specs=pl.BlockSpec((8, w), lambda i: (i, 0)),
        compiler_params=pltpu.CompilerParams(
            dimension_semantics=("parallel",),          # steps independent
            vmem_limit_bytes=48 * 1024 * 1024,
        ),
        cost_estimate=pl.CostEstimate(
            flops=flops, transcendentals=0, bytes_accessed=bytes_accessed),
    )(x, x)

    # Single cross-lane/sublane reduction + weight multiply in the epilogue.
    return jnp.sum(partials) * jnp.asarray(weight, dtype=jnp.float32)


def brenner_ref(x: jax.Array, weight) -> jax.Array:
    """Pure-JAX reference matching the PyTorch forward."""
    xf = x.astype(jnp.float32)
    dx = xf[2:, :] - xf[:-2, :]
    dy = xf[:, 2:] - xf[:, :-2]
    return (jnp.sum(dx * dx) + jnp.sum(dy * dy)) * jnp.float32(weight)


if __name__ == "__main__":
    key = jax.random.PRNGKey(0)
    k1, k2, k3 = jax.random.split(key, 3)

    # Multi-tile: exercises the cross-tile halo and the interior fast path.
    x1 = jax.random.normal(k1, (64, 256), dtype=jnp.float32)
    out1 = jax.block_until_ready(brenner(x1, 0.5, tile_h=16))
    ref1 = brenner_ref(x1, 0.5)
    assert jnp.allclose(out1, ref1, rtol=1e-4, atol=1e-3), (out1, ref1)

    # Ragged height: exercises the masked last-tile path.
    x2 = jax.random.normal(k2, (50, 256), dtype=jnp.float32)
    out2 = jax.block_until_ready(brenner(x2, 1.25, tile_h=16))
    ref2 = brenner_ref(x2, 1.25)
    assert jnp.allclose(out2, ref2, rtol=1e-4, atol=1e-3), (out2, ref2)

    # Default tiling + bf16 input (itemsize-aware tile sizing, in-kernel upcast).
    x3 = jax.random.normal(k3, (40, 128), dtype=jnp.bfloat16)
    out3 = jax.block_until_ready(brenner(x3, 2.0))
    ref3 = brenner_ref(x3, 2.0)
    assert jnp.allclose(out3, ref3, rtol=1e-3, atol=1e-1), (out3, ref3)

    print("KERNEL_OK")
</pallas_src>

<mosaic_0001>
module attributes {stable_mosaic.version = 11 : i64} {
  func.func @_brenner_kernel(%arg0: i32, %arg1: memref<16x256xf32, #tpu.memory_space<vmem>>, %arg2: memref<8x256xf32, #tpu.memory_space<vmem>>, %arg3: memref<8x256xf32, #tpu.memory_space<vmem>>) attributes {dimension_semantics = [#tpu.dimension_semantics<parallel>], iteration_bounds = array<i64: 4>, scalar_prefetch = 0 : i64, scratch_operands = 0 : i64, tpu.core_type = #tpu.core_type<tc>, window_params = [{transform_indices = @transform_0, window_bounds = array<i64: 16, 256>}, {transform_indices = @transform_1, window_bounds = array<i64: 8, 256>}, {transform_indices = @transform_2, window_bounds = array<i64: 8, 256>}]} {
    %c0 = arith.constant 0 : index
    %c0_0 = arith.constant 0 : index
    %0 = vector.load %arg1[%c0, %c0_0] : memref<16x256xf32, #tpu.memory_space<vmem>>, vector<16x256xf32>
    %c0_1 = arith.constant 0 : index
    %c0_2 = arith.constant 0 : index
    %1 = vector.load %arg2[%c0_1, %c0_2] : memref<8x256xf32, #tpu.memory_space<vmem>>, vector<8x256xf32>
    %c254_i32 = arith.constant 254 : i32
    %2 = tpu.dynamic_rotate %0 by %c254_i32 dim 1 : vector<16x256xf32>, i32 -> vector<16x256xf32>
    %c14_i32 = arith.constant 14 : i32
    %3 = tpu.dynamic_rotate %0 by %c14_i32 dim 0 : vector<16x256xf32>, i32 -> vector<16x256xf32>
    %c2_i32 = arith.constant 2 : i32
    %4 = tpu.dynamic_rotate %1 by %c2_i32 dim 0 : vector<8x256xf32>, i32 -> vector<8x256xf32>
    %5 = tpu.iota {dimensions = array<i32: 0>} : vector<8x256xi32>
    %6 = tpu.iota {dimensions = array<i32: 1>} : vector<8x256xi32>
    %c254_i32_3 = arith.constant 254 : i32
    %7 = vector.broadcast %c254_i32_3 : i32 to vector<8x256xi32>
    %8 = arith.cmpi slt, %6, %7 : vector<8x256xi32>
    %c16_i32 = arith.constant 16 : i32
    %9 = arith.muli %arg0, %c16_i32 : i32
    %c3_i32 = arith.constant 3 : i32
    %10 = arith.cmpi slt, %arg0, %c3_i32 : i32
    %11 = arith.extui %10 : i1 to i32
    %c0_i32 = arith.constant 0 : i32
    %12 = arith.cmpi ne, %11, %c0_i32 : i32
    scf.if %12 {
      %cst = arith.constant 0.000000e+00 : f32
      %16 = vector.broadcast %cst : f32 to vector<8x256xf32>
      %17 = vector.extract_strided_slice %0 {offsets = [0, 0], sizes = [8, 256], strides = [1, 1]} : vector<16x256xf32> to vector<8x256xf32>
      %18 = vector.extract_strided_slice %2 {offsets = [0, 0], sizes = [8, 256], strides = [1, 1]} : vector<16x256xf32> to vector<8x256xf32>
      %19 = arith.subf %18, %17 : vector<8x256xf32>
      %20 = arith.mulf %19, %19 : vector<8x256xf32>
      %cst_6 = arith.constant 0.000000e+00 : f32
      %21 = vector.broadcast %cst_6 : f32 to vector<8x256xf32>
      %22 = arith.select %8, %20, %21 : vector<8x256xi1>, vector<8x256xf32>
      %23 = vector.extract_strided_slice %3 {offsets = [0, 0], sizes = [8, 256], strides = [1, 1]} : vector<16x256xf32> to vector<8x256xf32>
      %24 = arith.subf %23, %17 : vector<8x256xf32>
      %25 = arith.mulf %24, %24 : vector<8x256xf32>
      %26 = arith.addf %22, %25 : vector<8x256xf32>
      %27 = arith.addf %16, %26 : vector<8x256xf32>
      %28 = vector.extract_strided_slice %0 {offsets = [8, 0], sizes = [8, 256], strides = [1, 1]} : vector<16x256xf32> to vector<8x256xf32>
      %29 = vector.extract_strided_slice %2 {offsets = [8, 0], sizes = [8, 256], strides = [1, 1]} : vector<16x256xf32> to vector<8x256xf32>
      %30 = arith.subf %29, %28 : vector<8x256xf32>
      %31 = arith.mulf %30, %30 : vector<8x256xf32>
      %cst_7 = arith.constant 0.000000e+00 : f32
      %32 = vector.broadcast %cst_7 : f32 to vector<8x256xf32>
      %33 = arith.select %8, %31, %32 : vector<8x256xi1>, vector<8x256xf32>
      %34 = vector.extract_strided_slice %3 {offsets = [8, 0], sizes = [8, 256], strides = [1, 1]} : vector<16x256xf32> to vector<8x256xf32>
      %35 = arith.subf %34, %28 : vector<8x256xf32>
      %36 = arith.mulf %35, %35 : vector<8x256xf32>
      %c6_i32 = arith.constant 6 : i32
      %37 = vector.broadcast %c6_i32 : i32 to vector<8x256xi32>
      %38 = arith.cmpi slt, %5, %37 : vector<8x256xi32>
      %cst_8 = arith.constant 0.000000e+00 : f32
      %39 = vector.broadcast %cst_8 : f32 to vector<8x256xf32>
      %40 = arith.select %38, %36, %39 : vector<8x256xi1>, vector<8x256xf32>
      %41 = arith.addf %33, %40 : vector<8x256xf32>
      %42 = arith.addf %27, %41 : vector<8x256xf32>
      %43 = vector.extract_strided_slice %0 {offsets = [0, 0], sizes = [8, 256], strides = [1, 1]} : vector<16x256xf32> to vector<8x256xf32>
      %44 = arith.subf %43, %4 : vector<8x256xf32>
      %c2_i32_9 = arith.constant 2 : i32
      %45 = vector.broadcast %c2_i32_9 : i32 to vector<8x256xi32>
      %46 = arith.cmpi slt, %5, %45 : vector<8x256xi32>
      %c0_i32_10 = arith.constant 0 : i32
      %47 = arith.cmpi sgt, %arg0, %c0_i32_10 : i32
      %48 = vector.broadcast %47 : i1 to vector<8x256xi1>
      %49 = arith.andi %46, %48 : vector<8x256xi1>
      %50 = arith.mulf %44, %44 : vector<8x256xf32>
      %cst_11 = arith.constant 0.000000e+00 : f32
      %51 = vector.broadcast %cst_11 : f32 to vector<8x256xf32>
      %52 = arith.select %49, %50, %51 : vector<8x256xi1>, vector<8x256xf32>
      %53 = arith.addf %42, %52 : vector<8x256xf32>
      %c0_12 = arith.constant 0 : index
      %c0_13 = arith.constant 0 : index
      %54 = vector.load %arg3[%c0_12, %c0_13] : memref<8x256xf32, #tpu.memory_space<vmem>>, vector<8x256xf32>
      tpu.vector_store %arg3[%c0_12, %c0_13], %53 {strides = array<i32>} : memref<8x256xf32, #tpu.memory_space<vmem>>, vector<8x256xf32>,
    } else {
    }
    %c3_i32_4 = arith.constant 3 : i32
    %13 = arith.cmpi eq, %arg0, %c3_i32_4 : i32
    %14 = arith.extui %13 : i1 to i32
    %c0_i32_5 = arith.constant 0 : i32
    %15 = arith.cmpi ne, %14, %c0_i32_5 : i32
    scf.if %15 {
      %cst = arith.constant 0.000000e+00 : f32
      %16 = vector.broadcast %cst : f32 to vector<8x256xf32>
      %17 = vector.extract_strided_slice %0 {offsets = [0, 0], sizes = [8, 256], strides = [1, 1]} : vector<16x256xf32> to vector<8x256xf32>
      %c0_i32_6 = arith.constant 0 : i32
      %18 = arith.addi %9, %c0_i32_6 : i32
      %19 = vector.broadcast %18 : i32 to vector<8x256xi32>
      %20 = arith.addi %19, %5 : vector<8x256xi32>
      %21 = vector.extract_strided_slice %2 {offsets = [0, 0], sizes = [8, 256], strides = [1, 1]} : vector<16x256xf32> to vector<8x256xf32>
      %22 = arith.subf %21, %17 : vector<8x256xf32>
      %23 = arith.mulf %22, %22 : vector<8x256xf32>
      %cst_7 = arith.constant 0.000000e+00 : f32
      %24 = vector.broadcast %cst_7 : f32 to vector<8x256xf32>
      %25 = arith.select %8, %23, %24 : vector<8x256xi1>, vector<8x256xf32>
      %c64_i32 = arith.constant 64 : i32
      %26 = vector.broadcast %c64_i32 : i32 to vector<8x256xi32>
      %27 = arith.cmpi slt, %20, %26 : vector<8x256xi32>
      %cst_8 = arith.constant 0.000000e+00 : f32
      %28 = vector.broadcast %cst_8 : f32 to vector<8x256xf32>
      %29 = arith.select %27, %25, %28 : vector<8x256xi1>, vector<8x256xf32>
      %30 = vector.extract_strided_slice %3 {offsets = [0, 0], sizes = [8, 256], strides = [1, 1]} : vector<16x256xf32> to vector<8x256xf32>
      %31 = arith.subf %30, %17 : vector<8x256xf32>
      %32 = arith.mulf %31, %31 : vector<8x256xf32>
      %c62_i32 = arith.constant 62 : i32
      %33 = vector.broadcast %c62_i32 : i32 to vector<8x256xi32>
      %34 = arith.cmpi slt, %20, %33 : vector<8x256xi32>
      %cst_9 = arith.constant 0.000000e+00 : f32
      %35 = vector.broadcast %cst_9 : f32 to vector<8x256xf32>
      %36 = arith.select %34, %32, %35 : vector<8x256xi1>, vector<8x256xf32>
      %37 = arith.addf %29, %36 : vector<8x256xf32>
      %38 = arith.addf %16, %37 : vector<8x256xf32>
      %39 = vector.extract_strided_slice %0 {offsets = [8, 0], sizes = [8, 256], strides = [1, 1]} : vector<16x256xf32> to vector<8x256xf32>
      %c8_i32 = arith.constant 8 : i32
      %40 = arith.addi %9, %c8_i32 : i32
      %41 = vector.broadcast %40 : i32 to vector<8x256xi32>
      %42 = arith.addi %41, %5 : vector<8x256xi32>
      %43 = vector.extract_strided_slice %2 {offsets = [8, 0], sizes = [8, 256], strides = [1, 1]} : vector<16x256xf32> to vector<8x256xf32>
      %44 = arith.subf %43, %39 : vector<8x256xf32>
      %45 = arith.mulf %44, %44 : vector<8x256xf32>
      %cst_10 = arith.constant 0.000000e+00 : f32
      %46 = vector.broadcast %cst_10 : f32 to vector<8x256xf32>
      %47 = arith.select %8, %45, %46 : vector<8x256xi1>, vector<8x256xf32>
      %c64_i32_11 = arith.constant 64 : i32
      %48 = vector.broadcast %c64_i32_11 : i32 to vector<8x256xi32>
      %49 = arith.cmpi slt, %42, %48 : vector<8x256xi32>
      %cst_12 = arith.constant 0.000000e+00 : f32
      %50 = vector.broadcast %cst_12 : f32 to vector<8x256xf32>
      %51 = arith.select %49, %47, %50 : vector<8x256xi1>, vector<8x256xf32>
      %52 = vector.extract_strided_slice %3 {offsets = [8, 0], sizes = [8, 256], strides = [1, 1]} : vector<16x256xf32> to vector<8x256xf32>
      %53 = arith.subf %52, %39 : vector<8x256xf32>
      %54 = arith.mulf %53, %53 : vector<8x256xf32>
      %c62_i32_13 = arith.constant 62 : i32
      %55 = vector.broadcast %c62_i32_13 : i32 to vector<8x256xi32>
      %56 = arith.cmpi slt, %42, %55 : vector<8x256xi32>
      %cst_14 = arith.constant 0.000000e+00 : f32
      %57 = vector.broadcast %cst_14 : f32 to vector<8x256xf32>
      %58 = arith.select %56, %54, %57 : vector<8x256xi1>, vector<8x256xf32>
      %59 = arith.addf %51, %58 : vector<8x256xf32>
      %60 = arith.addf %38, %59 : vector<8x256xf32>
      %61 = vector.extract_strided_slice %0 {offsets = [0, 0], sizes = [8, 256], strides = [1, 1]} : vector<16x256xf32> to vector<8x256xf32>
      %62 = arith.subf %61, %4 : vector<8x256xf32>
      %c2_i32_15 = arith.constant 2 : i32
      %63 = vector.broadcast %c2_i32_15 : i32 to vector<8x256xi32>
      %64 = arith.cmpi slt, %5, %63 : vector<8x256xi32>
      %c0_i32_16 = arith.constant 0 : i32
      %65 = arith.cmpi sgt, %arg0, %c0_i32_16 : i32
      %66 = vector.broadcast %65 : i1 to vector<8x256xi1>
      %67 = arith.andi %64, %66 : vector<8x256xi1>
      %68 = vector.broadcast %9 : i32 to vector<8x256xi32>
      %69 = arith.addi %68, %5 : vector<8x256xi32>
      %c64_i32_17 = arith.constant 64 : i32
      %70 = vector.broadcast %c64_i32_17 : i32 to vector<8x256xi32>
      %71 = arith.cmpi slt, %69, %70 : vector<8x256xi32>
      %72 = arith.andi %67, %71 : vector<8x256xi1>
      %73 = arith.mulf %62, %62 : vector<8x256xf32>
      %cst_18 = arith.constant 0.000000e+00 : f32
      %74 = vector.broadcast %cst_18 : f32 to vector<8x256xf32>
      %75 = arith.select %72, %73, %74 : vector<8x256xi1>, vector<8x256xf32>
      %76 = arith.addf %60, %75 : vector<8x256xf32>
      %c0_19 = arith.constant 0 : index
      %c0_20 = arith.constant 0 : index
      %77 = vector.load %arg3[%c0_19, %c0_20] : memref<8x256xf32, #tpu.memory_space<vmem>>, vector<8x256xf32>
      tpu.vector_store %arg3[%c0_19, %c0_20], %76 {strides = array<i32>} : memref<8x256xf32, #tpu.memory_space<vmem>>, vector<8x256xf32>,
    } else {
    }
    return
  }
  func.func @transform_0(%arg0: i32) -> (i32, i32) {
    %c0_i32 = arith.constant 0 : i32
    %c0_i32_0 = arith.constant 0 : i32
    return %arg0, %c0_i32 : i32, i32
  }
  func.func @transform_1(%arg0: i32) -> (i32, i32) {
    %c2_i32 = arith.constant 2 : i32
    %0 = arith.muli %arg0, %c2_i32 : i32
    %c1_i32 = arith.constant 1 : i32
    %1 = arith.subi %0, %c1_i32 : i32
    %c0_i32 = arith.constant 0 : i32
    %2 = arith.maxsi %1, %c0_i32 : i32
    %c0_i32_0 = arith.constant 0 : i32
    %c0_i32_1 = arith.constant 0 : i32
    return %2, %c0_i32_0 : i32, i32
  }
  func.func @transform_2(%arg0: i32) -> (i32, i32) {
    %c0_i32 = arith.constant 0 : i32
    %c0_i32_0 = arith.constant 0 : i32
    return %arg0, %c0_i32 : i32, i32
  }
}

</mosaic_0001>

<bundles_post_ra>
// kernel: tpu_custom_call.1
= control target key start
LH: loop header
LB: loop body
LE: loop exit
PB: predicated region body
PF: predicated region fallthrough
CT: control target
= control target key end

     0   :  { %s1123_s0 = inlined_call_operand.hbm [shape: f32[64,256], index: 0, kind: input, shape index: {}]   ;;  %s1124_s1 = inlined_call_operand.hbm [shape: f32[64,256], index: 1, kind: input, shape index: {}]   ;;  %s1125_s2 = inlined_call_operand.hbm [shape: f32[32,256], index: 2, kind: output, shape index: {}]  }
   0x1   :  { %1127 = sst [smem:[#allocation11_spill]] %s1123_s0 }
   0x2   :  { %7 = vsyncpa [#allocation3], 0 }
   0x3   :  { %9 = vsyncpa [#allocation3 + $0x1], 0 }
   0x4   :  { %10 = vsyncpa [#allocation6], 0 }
   0x5   :  { %12 = vsyncpa [#allocation6 + $0x1], 0 }
   0x6   :  { %13 = vsyncpa [#allocation4], 0 }
   0x7   :  { %15 = vsyncpa [#allocation4 + $0x1], 0  ;;  %s772_s9 = smov 0   ;;  %s774_s10 = smov 0  }
   0x8   :  { %s776_s11 = smov 0   ;;  %s778_s12 = smov 0  }
   0x9   :  { %s780_s13 = smov 0   ;;  %s782_s14 = smov 0  }
   0xa   :  { %s784_s15 = smov 0  }
   0xb LB: > { %s486_s16 = sadd.s32 4294967294, %s752_s15   ;;  %s809_s17 = sadd.s32 1, %s752_s15   ;;  %s752_s15 = sphi %s784_s15, %s1147_s15   ;;  %s748_s14 = sphi %s782_s14, %s1146_s14   ;;  %s744_s13 = sphi %s780_s13, %s1145_s13   ;;  %s740_s12 = sphi %s778_s12, %s1144_s12   ;;  %s736_s11 = sphi %s776_s11, %s1143_s11   ;;  %s732_s10 = sphi %s774_s10, %s1142_s10   ;;  %s728_s9 = sphi %s772_s9, %s1141_s9  }
   0xc   : > { %s25_s18 = ssub.s32 %s752_s15, %s809_s17  ;;  %s28_s19 = sadd.s32 1, %s748_s14 }
   0xd   : > { %p26_p0 = scmp.eq.s32.totalorder %s25_s18, 0  ;;  %p35_p1 = scmp.ne.s32.totalorder %s748_s14, %s744_s13 }
   0xe   : > { %p36_p2 = scmp.eq.s32.totalorder %s752_s15, 0  ;;  %p41_p3 = scmp.ne.s32.totalorder %s744_s13, %s740_s12 }
   0xf   : > { %s820_s20 = scalar_select %p26_p0, %s748_s14, %s28_s19  }
  0x10   : > { %p827_p4 = por %p36_p2, %p35_p1  ;;  %p105_p5 = scmp.eq.s32.totalorder %s486_s16, 3 }
  0x11   : > { %p1126_p6 = scmp.lt.s32.totalorder %s752_s15, 4  ;;  %s125_s23 = sand.u32 1, %s748_s14  }
  0x12   : > { %p835_p7 = por %p105_p5, %p41_p3  ;;  %s493_s24 = sshll.u32 %s125_s23, 5 }
  0x13   : > { %s517_s25 = sshll.u32 %s752_s15, 5  ;;  %s1130_s0 = sld [smem:[#allocation11_spill]] }
  0x14   : > { %s1129_s22 = scalar_select %p835_p7, 1, 0 }
  0x15   : > { %s129_s29 = scalar_lea.vmem [#allocation2], %s493_s24  ;;  %p848_p8 = pnand %p1126_p6, %p827_p4 }
  0x16   : > { %s138_s30 = sshll.u32 %s129_s29, 4  ;;  %p502_p9 = scmp.ge.s32.totalorder %s752_s15, 1  ;;  %s139_s30 = int_to_ptr.vmem [resolvable:$true] %s138_s30 }
  0x17   : > { %s126_s5 = scalar_lea.sflag [#allocation3], %s125_s23  ;;  %p602_p11 = pneg %p848_p8 }
  0x19   : > { %s135_s28 = scalar_lea.hbm %s1130_s0, %s517_s25  ;;  %s605_s18 = scalar_lea.hbm %s1130_s0, 128 }
  0x1a   : > { %s136_s3 = sshll.u32 %s135_s28, 4  ;;  %s137_s3 = int_to_ptr.hbm [resolvable:$true] %s136_s3 }
  0x1b   : > { %s598_s6 = sshra.s32 %s137_s3, 4  ;;  %s599_s6 = int_to_ptr.hbm [resolvable:$true] %s598_s6 }
  0x1c   : > { %s600_s7 = scalar_lea.hbm %s599_s6, 32  ;;  %p606_p0 = scmp.lt.s32.totalorder %s599_s6, %s1130_s0 }
  0x1d   : > { %p601_p10 = scmp.ne.s32.totalorder %s599_s6, %s600_s7  ;;  %p607_p4 = scmp.lt.s32.totalorder %s605_s18, %s600_s7 }
  0x1f   : > { %p603_p12 = pnand %p602_p11, %p601_p10  ;;  %p608_p5 = por %p607_p4, %p606_p0 }
  0x21   : > { %p604_p13 = pneg %p603_p12 }
  0x23   : > { %p609_p6 = pnand %p608_p5, %p604_p13 }
  0x25   : > { %612 = shalt.err (!%p609_p6)
}
  0x26   : > { %s754_s23 = smov 256   ;;  %s755_s24 = smov 16  }
  0x27   : > { %529 = dma.hbm_to_vmem [thread:$0]  (!%p848_p8), %s137_s3, 512, %s139_s30, %s126_s5, %s754_s23, %s754_s23, %s755_s24  }
  0x28   : > { %p170_p10 = scmp.lt.s32.totalorder %s752_s15, 5  ;;  %s871_s26 = sadd.s32 4294967295, %s752_s15  }
  0x29   : > { %s487_s27 = sshll.u32 %s752_s15, 1  ;;  %p42_p6 = scmp.eq.s32.totalorder %s871_s26, 0 }
  0x2a   : > { %p866_p11 = pnand %p502_p9, %p170_p10  ;;  %s488_s28 = sadd.s32 4294967295, %s487_s27 }
  0x2b   : > { %p53_p12 = scmp.gt.s32.totalorder %s488_s28, 0  ;;  %s515_s29 = sadd.s32 2, %s487_s27 }
  0x2c   : > { %p878_p8 = por %p42_p6, %p41_p3  ;;  %s490_s3 = sadd.s32 4294967295, %s515_s29 }
  0x2d   : > { %s1149_s28 = smov (!%p53_p12, %s488_s28), 0  ;;  %p57_p9 = scmp.gt.s32.totalorder %s490_s3, 0 }
  0x2e   : > { %p69_p13 = scmp.ne.s32.totalorder %s736_s11, %s732_s10  ;;  %p75_p0 = scmp.ne.s32.totalorder %s732_s10, %s728_s9 }
  0x2f   : > { %s1151_s3 = smov (!%p57_p9, %s490_s3), 0  ;;  %s62_s4 = sadd.s32 1, %s736_s11 }
  0x30   : > { %p887_p4 = por %p75_p0, %p42_p6  ;;  %s59_s6 = ssub.s32 %s1149_s28, %s1151_s3 }
  0x31   : > { %p99_p5 = scmp.eq.s32.totalorder %s871_s26, 3  ;;  %p60_p10 = scmp.eq.s32.totalorder %s59_s6, 0 }
  0x32   : > { %s148_s7 = sand.u32 1, %s736_s11   ;;  %p71_p3 = por %p69_p13, %p36_p2 }
  0x33   : > { %p898_p7 = por %p99_p5, %p35_p1  ;;  %s497_s9 = sshll.u32 %s148_s7, 4 }
  0x34   : > { %s903_s16 = scalar_select %p60_p10, %s736_s11, %s62_s4  }
  0x35   : > { %s518_s18 = sshll.u32 %s1149_s28, 4  ;;  %s152_s27 = scalar_lea.vmem [#allocation5], %s497_s9 }
  0x36   : > { %s161_s23 = scalar_lea.hbm %s1124_s1, %s518_s18  ;;  %s165_s29 = sshll.u32 %s152_s27, 4  ;;  %s166_s29 = int_to_ptr.vmem [resolvable:$true] %s165_s29 }
  0x37   : > { %s163_s24 = sshll.u32 %s161_s23, 4  ;;  %p1136_p6 = scmp.lt.s32.totalorder %s752_s15, 4  ;;  %s164_s24 = int_to_ptr.hbm [resolvable:$true] %s163_s24 }
  0x38   : > { %s149_s6 = scalar_lea.sflag [#allocation6], %s148_s7  ;;  %s628_s4 = sshra.s32 %s164_s24, 4  ;;  %s629_s4 = int_to_ptr.hbm [resolvable:$true] %s628_s4 }
  0x39   : > { %p910_p2 = pnand %p1136_p6, %p71_p3  ;;  %s630_s0 = scalar_lea.hbm %s629_s4, 16 }
  0x3a   : > { %p631_p1 = scmp.ne.s32.totalorder %s629_s4, %s630_s0  ;;  %s635_s18 = scalar_lea.hbm %s1124_s1, 128 }
  0x3b   : > { %p632_p12 = pneg %p910_p2  ;;  %p636_p0 = scmp.lt.s32.totalorder %s629_s4, %s1124_s1 }
  0x3c   : > { %p637_p5 = scmp.lt.s32.totalorder %s635_s18, %s630_s0 }
  0x3d   : > { %p633_p9 = pnand %p632_p12, %p631_p1 }
  0x3e   : > { %p638_p10 = por %p637_p5, %p636_p0 }
  0x3f   : > { %p634_p13 = pneg %p633_p9 }
  0x41   : > { %p639_p3 = pnand %p638_p10, %p634_p13 }
  0x43   : > { %642 = shalt.err (!%p639_p3)
}
  0x44   : > { %532 = dma.hbm_to_vmem [thread:$0]  (!%p910_p2), %s164_s24, 256, %s166_s29, %s149_s6  }
  0x45   : > { %174 = sbr.rel (%p866_p11) target bundleno = 262 (0x106), region = 28  ;;  %s927_s7 = sand.u32 (!%p866_p11), 1, %s744_s13  }
  0x46   : > { %s503_s23 = sshll.u32 (!%p866_p11), %s927_s7, 5  ;;  %s177_s27 = scalar_lea.sflag (!%p866_p11), [#allocation3], %s927_s7 }
  0x47   : > { %s180_s28 = scalar_lea.vmem (!%p866_p11), [#allocation2], %s503_s23 }
  0x4a   : > { %715 = dma.done.wait (%p878_p8), %s177_s27, 512  }
  0x4b   : > { %717 = vsyncadd (%p878_p8), %s177_s27, 4294966784  ;;  %s186_s0 = sand.u32 1, %s732_s10  }
  0x4c   : > { %s504_s24 = sshll.u32 %s186_s0, 4  ;;  %s187_s25 = scalar_lea.sflag [#allocation6], %s186_s0 }
  0x4d   : > { %s190_s29 = scalar_lea.vmem [#allocation5], %s504_s24 }
  0x4e   : > { %719 = dma.done.wait (%p887_p4), %s187_s25, 256  }
  0x4f   : > { %721 = vsyncadd (%p887_p4), %s187_s25, 4294967040  ;;  %v236_v0 = vlaneseq  ;;  %s505_s3 = sshll.u32 %s927_s7, 4  ;;  %s944_s6 = sshll.u32 %s871_s26, 4  ;;  %v946_v2 = vld [vmem:[%s190_s29] sm:$0xff]  ;;  %v948_v3 = vld [vmem:[%s190_s29 + $0x8] sm:$0xff] }
  0x50   : > { %v950_v4 = vld [vmem:[%s180_s28 + $0x8] sm:$0xff]  ;;  %v254_v5 = vrot.slane %v946_v2, 6  ;;  %v255_v6 = vrot.slane %v948_v3, 6  ;;  %s756_s30 = smov 126   ;;  %v957_v8 = vld [vmem:[%s180_s28] sm:$0xff]  ;;  %v959_v9 = vld [vmem:[%s180_s28 + $0x18] sm:$0xff] }
  0x51   : > { %v940_v1 = vshrl.u32 %v236_v0, 7  ;;  %232 = vrot.lane.b32.xlu1 %v950_v4, %s756_s30  ;;  %v244_v7 = vrot.slane %v950_v4, 2  ;;  %v961_v10 = vld [vmem:[%s180_s28 + $0x10] sm:$0xff]  ;;  %228 = vrot.lane.b32.xlu0 %v957_v8, %s756_s30  ;;  %v243_v11 = vrot.slane %v957_v8, 2  ;;  %v246_v12 = vrot.slane %v959_v9, 2  ;;  %s994_s5 = scalar_lea.vmem [#allocation7], %s505_s3 }
  0x52   : > { %v245_v13 = vrot.slane %v961_v10, 2  ;;  %v237_v18 = vand.u32 127, %v236_v0  ;;  %p507_p11 = scmp.ge.s32.totalorder %s871_s26, 3 }
  0x53   : > { %vm249_vm0 = vcmp.lt.s32.totalorder %v940_v1, 6  ;;  %p297_p8 = scmp.gt.s32.totalorder (!%p507_p11), %s871_s26, 0 }
  0x54   : > { %v969_v14 = vsel %vm249_vm0, %v244_v7, %v246_v12  ;;  %v973_v15 = vsel %vm249_vm0, %v246_v12, %v244_v7  ;;  %v977_v16 = vsel %vm249_vm0, %v243_v11, %v245_v13  ;;  %v981_v17 = vsel %vm249_vm0, %v245_v13, %v243_v11 }
  0x55   : > { %v985_v19 = vadd.s32 128, %v237_v18  ;;  %vm238_vm2 = vcmp.lt.s32.totalorder %v237_v18, 126 }
  0x57   : > { %vm258_vm1 = vcmp.lt.s32.totalorder %v985_v19, 254 }
  0x59   : > { %234 = vrot.lane.b32.xlu1 %v959_v9, %s756_s30  ;;  %230 = vrot.lane.b32.xlu0 %v961_v10, %s756_s30 }
  0xc3   : > { %v233_v20 = vpop.permute.xlu1 %232  ;;  %v229_v21 = vpop.permute.xlu0 %228 }
  0xc4   : > { %v239_v22 = vsel %vm238_vm2, %v229_v21, %v233_v20  ;;  %v988_v23 = vsel %vm238_vm2, %v233_v20, %v229_v21 }
  0xc8   : > { %263 = sbr.rel (%p507_p11) target bundleno = 221 (0xdd), region = 40 }
  0xcb   : > { %v235_v24 = vpop.permute.xlu1 %234  ;;  %v231_v25 = vpop.permute.xlu0 %230 }
  0xcc   : > { %v240_v26 = vsel %vm238_vm2, %v231_v25, %v235_v24  ;;  %v990_v27 = vsel %vm238_vm2, %v235_v24, %v231_v25 }
  0xcd   : > { %v264_v28 = vsub.f32 %v239_v22, %v957_v8  ;;  %v270_v29 = vsub.f32 %v977_v16, %v957_v8  ;;  %v278_v30 = vsub.f32 %v240_v26, %v961_v10  ;;  %v284_v31 = vsub.f32 %v981_v17, %v961_v10  ;;  %s298_s4 = scalar_select %p297_p8, 1, 0 }
  0xce   : > { %v294_v32 = vsub.f32 %v957_v8, %v254_v5  ;;  %vm296_vm3 = vcmp.lt.s32.totalorder %v940_v1, 2  ;;  %v265_v33 = vsub.f32 %v988_v23, %v950_v4  ;;  %v271_v34 = vsub.f32 %v969_v14, %v950_v4 }
  0xcf   : > { %v266_v35 = vmul.f32 %v264_v28, %v264_v28  ;;  %v272_v36 = vmul.f32 %v270_v29, %v270_v29  ;;  %v280_v37 = vmul.f32 %v278_v30, %v278_v30  ;;  %v286_v38 = vmul.f32 %v284_v31, %v284_v31 }
  0xd0   : > { %v302_v39 = vmul.f32 %v294_v32, %v294_v32  ;;  %v267_v40 = vmul.f32 %v265_v33, %v265_v33  ;;  %v273_v41 = vmul.f32 %v271_v34, %v271_v34  ;;  %v279_v42 = vsub.f32 %v990_v27, %v959_v9 }
  0xd1   : > { %v274_v43 = vadd.f32 %v272_v36, %v266_v35  ;;  %v288_v44 = vsel %vm249_vm0, %v286_v38, 0.0  ;;  %v299_v45 = vstv %s298_s4  ;;  %v285_v46 = vsub.f32 %v973_v15, %v959_v9 }
  0xd2   : > { %v290_v47 = vadd.f32 %v288_v44, %v280_v37  ;;  %vm300_vm4 = vcmp.eq.s32.totalorder %v299_v45, 1  ;;  %v269_v48 = vsel %vm258_vm1, %v267_v40, 0.0  ;;  %v281_v49 = vmul.f32 %v279_v42, %v279_v42 }
  0xd3   : > { %vm301_vm5 = vmand %vm296_vm3, %vm300_vm4  ;;  %v287_v50 = vmul.f32 %v285_v46, %v285_v46  ;;  %v295_v51 = vsub.f32 %v950_v4, %v255_v6  ;;  %v275_v54 = vadd.f32 %v273_v41, %v269_v48 }
  0xd4   : > { %v292_v52 = vadd.f32 %v290_v47, %v274_v43  ;;  %v304_v53 = vsel %vm301_vm5, %v302_v39, 0.0  ;;  %v283_v55 = vsel %vm258_vm1, %v281_v49, 0.0 }
  0xd5   : > { %v289_v56 = vsel %vm249_vm0, %v287_v50, 0.0  ;;  %v303_v57 = vmul.f32 %v295_v51, %v295_v51 }
  0xd6   : > { %v306_v58 = vadd.f32 %v304_v53, %v292_v52  ;;  %v291_v59 = vadd.f32 %v289_v56, %v283_v55 }
  0xd7   : > { %v305_v60 = vsel %vm301_vm5, %v303_v57, 0.0 }
  0xd8   : > { %308 = vst [vmem:[%s994_s5] sm:$0xff] %v306_v58  ;;  %v293_v61 = vadd.f32 %v291_v59, %v275_v54 }
  0xda   : > { %v307_v62 = vadd.f32 %v305_v60, %v293_v61 }
  0xdc   : > { %309 = vst [vmem:[%s994_s5 + $0x8] sm:$0xff] %v307_v62 }
  0xdd PF: > { %p508_p4 = scmp.ne.s32.totalorder %s871_s26, 3 }
  0xde   : > { %s336_s9 = sadd.s32 (!%p508_p4), 8, %s944_s6  ;;  %p362_p6 = scmp.gt.s32.totalorder (!%p508_p4), %s871_s26, 0 }
  0xdf   : > { %313 = sbr.rel (%p508_p4) target bundleno = 248 (0xf8), region = 44 }
  0xe4   : > { %v314_v63 = vstv %s944_s6  ;;  %v316_v0 = vsub.f32 %v239_v22, %v957_v8  ;;  %v325_v7 = vsub.f32 %v977_v16, %v957_v8  ;;  %v339_v11 = vsub.f32 %v240_v26, %v961_v10  ;;  %s363_s18 = scalar_select %p362_p6, 1, 0 }
  0xe5   : > { %v315_v12 = vadd.s32 %v314_v63, %v940_v1  ;;  %v337_v13 = vstv %s336_s9  ;;  %v348_v18 = vsub.f32 %v981_v17, %v961_v10  ;;  %v359_v20 = vsub.f32 %v957_v8, %v254_v5 }
  0xe6   : > { %v318_v21 = vmul.f32 %v316_v0, %v316_v0  ;;  %v327_v24 = vmul.f32 %v325_v7, %v325_v7  ;;  %v338_v22 = vadd.s32 %v337_v13, %v940_v1  ;;  %v341_v25 = vmul.f32 %v339_v11, %v339_v11 }
  0xe7   : > { %vm322_vm6 = vcmp.lt.s32.totalorder %v315_v12, 64  ;;  %vm329_vm7 = vcmp.lt.s32.totalorder %v315_v12, 62  ;;  %v350_v16 = vmul.f32 %v348_v18, %v348_v18  ;;  %vm361_vm8 = vcmp.lt.s32.totalorder %v940_v1, 2 }
  0xe8   : > { %v323_v26 = vsel %vm322_vm6, %v318_v21, 0.0  ;;  %v330_v28 = vsel %vm329_vm7, %v327_v24, 0.0  ;;  %vm345_vm9 = vcmp.lt.s32.totalorder %v338_v22, 64  ;;  %vm352_vm10 = vcmp.lt.s32.totalorder %v338_v22, 62 }
  0xe9   : > { %v332_v2 = vadd.f32 %v330_v28, %v323_v26  ;;  %v346_v5 = vsel %vm345_vm9, %v341_v25, 0.0  ;;  %v353_v8 = vsel %vm352_vm10, %v350_v16, 0.0  ;;  %v364_v10 = vstv %s363_s18 }
  0xea   : > { %v355_v17 = vadd.f32 %v353_v8, %v346_v5  ;;  %vm365_vm11 = vcmp.eq.s32.totalorder %v364_v10, 1  ;;  %v368_v29 = vmul.f32 %v359_v20, %v359_v20  ;;  %v317_v30 = vsub.f32 %v988_v23, %v950_v4 }
  0xeb   : > { %vm366_vm12 = vmand %vm361_vm8, %vm365_vm11  ;;  %v326_v1 = vsub.f32 %v969_v14, %v950_v4  ;;  %v340_v31 = vsub.f32 %v990_v27, %v959_v9  ;;  %v349_v32 = vsub.f32 %v973_v15, %v959_v9  ;;  %v360_v33 = vsub.f32 %v950_v4, %v255_v6 }
  0xec   : > { %v357_v34 = vadd.f32 %v355_v17, %v332_v2  ;;  %vm1063_vm13 = vmand %vm366_vm12, %vm322_vm6  ;;  %v319_v23 = vmul.f32 %v317_v30, %v317_v30 }
  0xed   : > { %v370_v14 = vsel %vm1063_vm13, %v368_v29, 0.0  ;;  %v328_v36 = vmul.f32 %v326_v1, %v326_v1  ;;  %v342_v27 = vmul.f32 %v340_v31, %v340_v31  ;;  %v351_v37 = vmul.f32 %v349_v32, %v349_v32 }
  0xee   : > { %v372_v9 = vadd.f32 %v370_v14, %v357_v34  ;;  %v321_v3 = vsel %vm258_vm1, %v319_v23, 0.0  ;;  %v369_v15 = vmul.f32 %v360_v33, %v360_v33 }
  0xef   : > { %v324_v4 = vsel %vm322_vm6, %v321_v3, 0.0  ;;  %v331_v6 = vsel %vm329_vm7, %v328_v36, 0.0  ;;  %v344_v38 = vsel %vm258_vm1, %v342_v27, 0.0  ;;  %v354_v39 = vsel %vm352_vm10, %v351_v37, 0.0 }
  0xf0   : > { %374 = vst [vmem:[%s994_s5] sm:$0xff] %v372_v9  ;;  %v333_v40 = vadd.f32 %v331_v6, %v324_v4  ;;  %v347_v41 = vsel %vm345_vm9, %v344_v38, 0.0  ;;  %v371_v43 = vsel %vm1063_vm13, %v369_v15, 0.0 }
  0xf1   : > { %v356_v42 = vadd.f32 %v354_v39, %v347_v41 }
  0xf3   : > { %v358_v44 = vadd.f32 %v356_v42, %v333_v40 }
  0xf5   : > { %v373_v45 = vadd.f32 %v371_v43, %v358_v44 }
  0xf7   : > { %375 = vst [vmem:[%s994_s5 + $0x8] sm:$0xff] %v373_v45 }
  0xf8 PF: > { %s388_s21 = scalar_lea.hbm %s1125_s2, %s944_s6  ;;  %s390_s23 = sshll.u32 %s994_s5, 4  ;;  %s391_s23 = int_to_ptr.vmem [resolvable:$true] %s390_s23 }
  0xf9   : > { %s392_s27 = sshll.u32 %s388_s21, 4  ;;  %s377_s28 = scalar_lea.sflag [#allocation4], %s927_s7  ;;  %s393_s27 = int_to_ptr.hbm [resolvable:$true] %s392_s27 }
  0xfa   : > { %s672_s0 = sshra.s32 %s393_s27, 4  ;;  %s678_s3 = scalar_lea.hbm %s1125_s2, 64  ;;  %s673_s0 = int_to_ptr.hbm [resolvable:$true] %s672_s0 }
  0xfb   : > { %s674_s24 = scalar_lea.hbm %s673_s0, 16  ;;  %p679_p9 = scmp.lt.s32.totalorder %s673_s0, %s1125_s2 }
  0xfc   : > { %p675_p2 = scmp.ne.s32.totalorder %s673_s0, %s674_s24  ;;  %p680_p13 = scmp.lt.s32.totalorder %s678_s3, %s674_s24 }
  0xfe   : > { %p676_p1 = pnand %p675_p2, %p898_p7  ;;  %p681_p0 = por %p680_p13, %p679_p9 }
 0x100   : > { %p677_p12 = pneg %p676_p1 }
 0x102   : > { %p682_p5 = pnand %p681_p0, %p677_p12 }
 0x104   : > { %685 = shalt.err (!%p682_p5)
}
 0x105   : > { %524 = dma.vmem_to_hbm [thread:$0]  (%p898_p7), %s391_s23, 256, %s393_s27, %s377_s28  }
 0x106 PF: > { %p538_p10 = scmp.ge.s32.totalorder %s752_s15, 2  ;;  %s404_s7 = sand.u32 1, %s740_s12  }
 0x107   : > { %p1140_p3 = scmp.ne.s32.totalorder %s1129_s22, 0  ;;  %s405_s6 = scalar_lea.sflag [#allocation4], %s404_s7 }
 0x109   : > { %p534_p11 = pnand %p538_p10, %p1140_p3 }
 0x10b   : > { %p535_p8 = pneg %p534_p11 }
 0x10d   : > { %723 = dma.done.wait (%p535_p8), %s405_s6, 256  }
 0x10e   : > { %725 = vsyncadd (%p535_p8), %s405_s6, 4294967040  ;;  %p18_p7 = scmp.ge.s32.totalorder %s809_s17, 6   ;;  %s1141_s9 = smov %s732_s10 }
 0x10f   : > { %s1142_s10 = smov %s736_s11  ;;  %s1143_s11 = smov %s903_s16 }
 0x110   : > { %s1144_s12 = smov %s744_s13  ;;  %s1145_s13 = smov %s748_s14 }
 0x111   : > { %s1146_s14 = smov %s820_s20  ;;  %s1147_s15 = smov %s809_s17 }
 0x112   :  { %20 = sbr.rel (!%p18_p7) target bundleno = 11 (0xb), region = 94 }
 0x117   :  { %411 = vsyncpa [#allocation3], 1 }
 0x118   :  { %413 = vsyncpa [#allocation3 + $0x1], 1 }
 0x119   :  { %414 = vsyncpa [#allocation6], 1 }
 0x11a   :  { %416 = vsyncpa [#allocation6 + $0x1], 1 }
 0x11b   :  { %417 = vsyncpa [#allocation4], 1 }
 0x11c   :  { %419 = vsyncpa [#allocation4 + $0x1], 1 }

</bundles_post_ra>
